<compile_context>
chip_gen: v6e
topology: v6e:2x2x1
jax: 0.10.0
libtpu: 0.0.40
codegen_flags: <defaults>
</compile_context>

<pallas_src>
import math
import jax
import jax.numpy as jnp
from jax.experimental import pallas as pl
from jax.experimental.pallas import tpu as pltpu


def _mlp_policy_kernel(
    x_ref,                  # (TB, input_size)  concatenated [s | st] batch tile
    w1_ref, b1_ref,         # fc1: (input_size, H), (1, H)
    w2_ref, b2_ref,         # fc2: (H, H), (1, H)
    wh_ref, bh_ref,         # packed value|action head: (H, 1+A), (1, 1+A)
    out_ref,                # packed output tile: (TB, 1+A) = [v | ac_mean]
):
    x = x_ref[...]

    # fc1 + tanh  (single K=input_size MXU push)
    h = jnp.tanh(
        jnp.dot(x, w1_ref[...], preferred_element_type=jnp.float32) + b1_ref[...]
    )

    # fc2 + tanh
    h = jnp.tanh(
        jnp.dot(h, w2_ref[...], preferred_element_type=jnp.float32) + b2_ref[...]
    )

    # fused value + action heads -> one lane-denser packed store
    out_ref[...] = (
        jnp.dot(h, wh_ref[...], preferred_element_type=jnp.float32) + bh_ref[...]
    )


def mlp_policy_forward(s, st, params, log_std_value, *, batch_tile=None):
    """Runs the MLPPolicy forward pass with one Pallas call.

    s:  (B, s_dim) f32
    st: (B, st_dim) f32
    params: dict of transposed weights/biases (see init_params)
    log_std_value: python float (constant log-std, as in MLPPolicy.std)

    Returns (v, ac_mean, ac_std) matching the PyTorch module. ac_std is the
    constant log-std broadcast (same as the torch code), produced in the
    wrapper since it involves no compute.
    """
    B = s.shape[0]
    # Concat fused into the wrapper: one contiguous (B, input_size) activation.
    x = jnp.concatenate([s, st], axis=1)
    input_size = x.shape[1]
    H = params["w1"].shape[1]
    A = params["wa"].shape[1]
    HA = 1 + A

    # Pack value|action head weights once (trivial XLA op in the wrapper).
    wh = jnp.concatenate([params["wv"], params["wa"]], axis=1)   # (H, 1+A)
    bh = jnp.concatenate([params["bv"], params["ba"]], axis=1)   # (1, 1+A)

    if batch_tile is None:
        # Keep the sublane axis a multiple of 8; at small B just take it whole.
        batch_tile = B if B <= 128 else 128
    assert B % batch_tile == 0, "batch must divide evenly into batch tiles"

    grid = (B // batch_tile,)
    const = lambda i: (0, 0)   # weights / biases grid-resident (no re-DMA per tile)

    packed = pl.pallas_call(
        _mlp_policy_kernel,
        out_shape=jax.ShapeDtypeStruct((B, HA), jnp.float32),
        grid=grid,
        in_specs=[
            pl.BlockSpec((batch_tile, input_size), lambda i: (i, 0)),  # x tile
            pl.BlockSpec((input_size, H), const),                      # w1
            pl.BlockSpec((1, H), const),                               # b1
            pl.BlockSpec((H, H), const),                               # w2
            pl.BlockSpec((1, H), const),                               # b2
            pl.BlockSpec((H, HA), const),                              # wh (packed)
            pl.BlockSpec((1, HA), const),                              # bh (packed)
        ],
        out_specs=pl.BlockSpec((batch_tile, HA), lambda i: (i, 0)),
        compiler_params=pltpu.CompilerParams(
            dimension_semantics=("parallel",),   # v7x: split batch tiles over 2 TCs
        ),
    )(x, params["w1"], params["b1"], params["w2"], params["b2"], wh, bh)

    v = packed[:, :1]        # (B, 1)
    ac_mean = packed[:, 1:]  # (B, A)
    # Constant log-std broadcast — pure wrapper op, no kernel work needed.
    ac_std = jnp.full((B, A), log_std_value, dtype=jnp.float32)
    return v, ac_mean, ac_std


def init_params(key, s_dim, st_dim, hidden, a_shape):
    """Deterministic init mimicking nn.Linear's default U(-1/sqrt(fan_in), ...).

    Weights are stored transposed vs torch: shape (in_features, out_features).
    """
    input_size = s_dim + st_dim

    def linear(k, fan_in, fan_out):
        kw, kb = jax.random.split(k)
        bound = 1.0 / math.sqrt(fan_in)
        w = jax.random.uniform(kw, (fan_in, fan_out), jnp.float32, -bound, bound)
        b = jax.random.uniform(kb, (1, fan_out), jnp.float32, -bound, bound)
        return w, b

    k1, k2, k3, k4 = jax.random.split(key, 4)
    w1, b1 = linear(k1, input_size, hidden)
    w2, b2 = linear(k2, hidden, hidden)
    wv, bv = linear(k3, hidden, 1)
    wa, ba = linear(k4, hidden, a_shape)

    return {
        "w1": w1, "b1": b1,
        "w2": w2, "b2": b2,
        "wv": wv, "bv": bv,
        "wa": wa, "ba": ba,
    }


def reference_forward(s, st, params, log_std_value):
    """Plain-JAX reference with identical semantics (for verification)."""
    x = jnp.concatenate([s, st], axis=1)
    x = jnp.tanh(x @ params["w1"] + params["b1"])
    x = jnp.tanh(x @ params["w2"] + params["b2"])
    v = x @ params["wv"] + params["bv"]
    ac_mean = x @ params["wa"] + params["ba"]
    ac_std = jnp.full_like(ac_mean, log_std_value)
    return v, ac_mean, ac_std


if __name__ == "__main__":
    # Small shapes consistent with the module: state obs + target state obs
    # concatenated along features, MLP hidden width, action dim.
    B = 8          # batch (multiple of 8 -> clean sublane tiling)
    S_DIM = 16     # s feature dim
    ST_DIM = 16    # s_target feature dim  (input_size = 32)
    HIDDEN = 32    # args.hidden
    A_SHAPE = 8    # a_shape

    # args.std_start / std_stop / num_frames with n = 0 => log_std = std_start
    STD_START, STD_STOP, TOTAL_N, N = -0.6, -1.7, 1_000_000, 0
    log_std_value = STD_START - (STD_START - STD_STOP) * (N / TOTAL_N)

    key = jax.random.PRNGKey(0)
    k_s, k_st, k_p = jax.random.split(key, 3)
    s = jax.random.normal(k_s, (B, S_DIM), jnp.float32)
    st = jax.random.normal(k_st, (B, ST_DIM), jnp.float32)
    params = init_params(k_p, S_DIM, ST_DIM, HIDDEN, A_SHAPE)

    v, ac_mean, ac_std = mlp_policy_forward(s, st, params, log_std_value)
    jax.block_until_ready((v, ac_mean, ac_std))

    v_ref, mean_ref, std_ref = reference_forward(s, st, params, log_std_value)
    assert v.shape == (B, 1) and ac_mean.shape == (B, A_SHAPE) and ac_std.shape == (B, A_SHAPE)
    assert jnp.allclose(v, v_ref, atol=1e-5)
    assert jnp.allclose(ac_mean, mean_ref, atol=1e-5)
    assert jnp.allclose(ac_std, std_ref, atol=1e-6)

    print("KERNEL_OK")
</pallas_src>

<mosaic_0001>
module attributes {stable_mosaic.version = 11 : i64} {
  func.func @_mlp_policy_kernel(%arg0: i32, %arg1: memref<8x32xf32, #tpu.memory_space<vmem>>, %arg2: memref<32x32xf32, #tpu.memory_space<vmem>>, %arg3: memref<1x32xf32, #tpu.memory_space<vmem>>, %arg4: memref<32x32xf32, #tpu.memory_space<vmem>>, %arg5: memref<1x32xf32, #tpu.memory_space<vmem>>, %arg6: memref<32x9xf32, #tpu.memory_space<vmem>>, %arg7: memref<1x9xf32, #tpu.memory_space<vmem>>, %arg8: memref<8x9xf32, #tpu.memory_space<vmem>>) attributes {dimension_semantics = [#tpu.dimension_semantics<parallel>], iteration_bounds = array<i64: 1>, scalar_prefetch = 0 : i64, scratch_operands = 0 : i64, tpu.core_type = #tpu.core_type<tc>, window_params = [{transform_indices = @transform_0, window_bounds = array<i64: 8, 32>}, {pipeline_mode = #tpu.pipeline_mode<synchronous>, transform_indices = @transform_1, window_bounds = array<i64: 32, 32>}, {pipeline_mode = #tpu.pipeline_mode<synchronous>, transform_indices = @transform_2, window_bounds = array<i64: 1, 32>}, {pipeline_mode = #tpu.pipeline_mode<synchronous>, transform_indices = @transform_3, window_bounds = array<i64: 32, 32>}, {pipeline_mode = #tpu.pipeline_mode<synchronous>, transform_indices = @transform_4, window_bounds = array<i64: 1, 32>}, {pipeline_mode = #tpu.pipeline_mode<synchronous>, transform_indices = @transform_5, window_bounds = array<i64: 32, 9>}, {pipeline_mode = #tpu.pipeline_mode<synchronous>, transform_indices = @transform_6, window_bounds = array<i64: 1, 9>}, {transform_indices = @transform_7, window_bounds = array<i64: 8, 9>}]} {
    %c0 = arith.constant 0 : index
    %c0_0 = arith.constant 0 : index
    %0 = vector.load %arg1[%c0, %c0_0] : memref<8x32xf32, #tpu.memory_space<vmem>>, vector<8x32xf32>
    %c0_1 = arith.constant 0 : index
    %c0_2 = arith.constant 0 : index
    %1 = vector.load %arg2[%c0_1, %c0_2] : memref<32x32xf32, #tpu.memory_space<vmem>>, vector<32x32xf32>
    %cst = arith.constant dense<0.000000e+00> : vector<8x32xf32>
    %2 = tpu.matmul %0, %1, %cst {dimension_numbers = #tpu.dot_dimension_numbers<[1], [0], [0], [1], [0, 0, 1, 1], [], []>} : vector<8x32xf32>, vector<32x32xf32>, vector<8x32xf32> -> vector<8x32xf32>
    %c0_3 = arith.constant 0 : index
    %c0_4 = arith.constant 0 : index
    %3 = vector.load %arg3[%c0_3, %c0_4] : memref<1x32xf32, #tpu.memory_space<vmem>>, vector<1x32xf32>
    %4 = vector.broadcast %3 : vector<1x32xf32> to vector<8x32xf32>
    %5 = arith.addf %2, %4 : vector<8x32xf32>
    %6 = math.tanh %5 : vector<8x32xf32>
    %c0_5 = arith.constant 0 : index
    %c0_6 = arith.constant 0 : index
    %7 = vector.load %arg4[%c0_5, %c0_6] : memref<32x32xf32, #tpu.memory_space<vmem>>, vector<32x32xf32>
    %cst_7 = arith.constant dense<0.000000e+00> : vector<8x32xf32>
    %8 = tpu.matmul %6, %7, %cst_7 {dimension_numbers = #tpu.dot_dimension_numbers<[1], [0], [0], [1], [0, 0, 1, 1], [], []>} : vector<8x32xf32>, vector<32x32xf32>, vector<8x32xf32> -> vector<8x32xf32>
    %c0_8 = arith.constant 0 : index
    %c0_9 = arith.constant 0 : index
    %9 = vector.load %arg5[%c0_8, %c0_9] : memref<1x32xf32, #tpu.memory_space<vmem>>, vector<1x32xf32>
    %10 = vector.broadcast %9 : vector<1x32xf32> to vector<8x32xf32>
    %11 = arith.addf %8, %10 : vector<8x32xf32>
    %12 = math.tanh %11 : vector<8x32xf32>
    %c0_10 = arith.constant 0 : index
    %c0_11 = arith.constant 0 : index
    %13 = vector.load %arg6[%c0_10, %c0_11] : memref<32x9xf32, #tpu.memory_space<vmem>>, vector<32x9xf32>
    %cst_12 = arith.constant dense<0.000000e+00> : vector<8x9xf32>
    %14 = tpu.matmul %12, %13, %cst_12 {dimension_numbers = #tpu.dot_dimension_numbers<[1], [0], [0], [1], [0, 0, 1, 1], [], []>} : vector<8x32xf32>, vector<32x9xf32>, vector<8x9xf32> -> vector<8x9xf32>
    %c0_13 = arith.constant 0 : index
    %c0_14 = arith.constant 0 : index
    %15 = vector.load %arg7[%c0_13, %c0_14] : memref<1x9xf32, #tpu.memory_space<vmem>>, vector<1x9xf32>
    %16 = vector.broadcast %15 : vector<1x9xf32> to vector<8x9xf32>
    %17 = arith.addf %14, %16 : vector<8x9xf32>
    %c0_15 = arith.constant 0 : index
    %c0_16 = arith.constant 0 : index
    %18 = vector.load %arg8[%c0_15, %c0_16] : memref<8x9xf32, #tpu.memory_space<vmem>>, vector<8x9xf32>
    tpu.vector_store %arg8[%c0_15, %c0_16], %17 {strides = array<i32>} : memref<8x9xf32, #tpu.memory_space<vmem>>, vector<8x9xf32>,
    return
  }
  func.func @transform_0(%arg0: i32) -> (i32, i32) {
    %c0_i32 = arith.constant 0 : i32
    %c0_i32_0 = arith.constant 0 : i32
    return %arg0, %c0_i32 : i32, i32
  }
  func.func @transform_1(%arg0: i32) -> (i32, i32) {
    %c0_i32 = arith.constant 0 : i32
    %c0_i32_0 = arith.constant 0 : i32
    %c0_i32_1 = arith.constant 0 : i32
    return %c0_i32, %c0_i32_0 : i32, i32
  }
  func.func @transform_2(%arg0: i32) -> (i32, i32) {
    %c0_i32 = arith.constant 0 : i32
    %c0_i32_0 = arith.constant 0 : i32
    %c0_i32_1 = arith.constant 0 : i32
    return %c0_i32, %c0_i32_0 : i32, i32
  }
  func.func @transform_3(%arg0: i32) -> (i32, i32) {
    %c0_i32 = arith.constant 0 : i32
    %c0_i32_0 = arith.constant 0 : i32
    %c0_i32_1 = arith.constant 0 : i32
    return %c0_i32, %c0_i32_0 : i32, i32
  }
  func.func @transform_4(%arg0: i32) -> (i32, i32) {
    %c0_i32 = arith.constant 0 : i32
    %c0_i32_0 = arith.constant 0 : i32
    %c0_i32_1 = arith.constant 0 : i32
    return %c0_i32, %c0_i32_0 : i32, i32
  }
  func.func @transform_5(%arg0: i32) -> (i32, i32) {
    %c0_i32 = arith.constant 0 : i32
    %c0_i32_0 = arith.constant 0 : i32
    %c0_i32_1 = arith.constant 0 : i32
    return %c0_i32, %c0_i32_0 : i32, i32
  }
  func.func @transform_6(%arg0: i32) -> (i32, i32) {
    %c0_i32 = arith.constant 0 : i32
    %c0_i32_0 = arith.constant 0 : i32
    %c0_i32_1 = arith.constant 0 : i32
    return %c0_i32, %c0_i32_0 : i32, i32
  }
  func.func @transform_7(%arg0: i32) -> (i32, i32) {
    %c0_i32 = arith.constant 0 : i32
    %c0_i32_0 = arith.constant 0 : i32
    return %arg0, %c0_i32 : i32, i32
  }
}

</mosaic_0001>

<bundles_post_ra>
// kernel: tpu_custom_call.1
= control target key start
LH: loop header
LB: loop body
LE: loop exit
PB: predicated region body
PF: predicated region fallthrough
CT: control target
= control target key end

     0   :  { %12 = vsyncpa [#allocation3], 0  ;;  %s516_s0 = inlined_call_operand.vmem [shape: f32[8,32], index: 0, kind: input, shape index: {}]   ;;  %s517_s1 = inlined_call_operand.vmem [shape: f32[32,32], index: 1, kind: input, shape index: {}]   ;;  %s518_s2 = inlined_call_operand.vmem [shape: f32[1,32], index: 2, kind: input, shape index: {}]   ;;  %s519_s3 = inlined_call_operand.hbm [shape: f32[32,32], index: 3, kind: input, shape index: {}]   ;;  %s520_s4 = inlined_call_operand.vmem [shape: f32[1,32], index: 4, kind: input, shape index: {}]   ;;  %s521_s5 = inlined_call_operand.vmem [shape: f32[32,9], index: 5, kind: input, shape index: {}]   ;;  %s522_s6 = inlined_call_operand.vmem [shape: f32[1,9], index: 6, kind: input, shape index: {}]   ;;  %s523_s7 = inlined_call_operand.hbm [shape: f32[8,9], index: 7, kind: output, shape index: {}]  }
   0x1   :  { %13 = vsyncpa [#allocation4], 0  ;;  %s422_s24 = smov [#allocation2]  }
   0x2   :  { %s25_s25 = sshll.u32 %s422_s24, 4  ;;  %s26_s25 = int_to_ptr.vmem [resolvable:$true] %s25_s25 }
   0x3   :  { %s386_s26 = scalar_lea.vmem %s26_s25, 512  ;;  %p391_p1 = scmp.lt.s32.totalorder %s26_s25, %s26_s25 }
   0x4   :  { %p387_p0 = scmp.ne.s32.totalorder %s26_s25, %s386_s26  ;;  %p392_p2 = scmp.lt.s32.totalorder %s386_s26, %s386_s26 }
   0x6   :  { %p393_p3 = por %p392_p2, %p391_p1 }
   0x8   :  { %p394_p4 = pnand %p393_p3, %p387_p0 }
   0xa   :  { %397 = shalt.err (!%p394_p4)
}
   0xb   :  { %s423_s27 = smov 128   ;;  %s424_s28 = smov 8  }
   0xc   :  { %31 = dma.hbm_to_vmem [thread:$0]  %s519_s3, 512, %s26_s25, [#allocation3], %s423_s27, %s423_s27, %s424_s28  }
   0xd   :  { %418 = dma.done.wait [#allocation3], 512  }
   0xe   :  { %419 = vsyncadd [#allocation3], 4294966784  ;;  %v425_v0 = vmov 0.0   ;;  %vm426_vm0 = vmmov 0   ;;  %v45_v1 = vld [vmem:[%s517_s1 + $0x18] sm:$0xff]  ;;  %v44_v2 = vld [vmem:[%s517_s1 + $0x10] sm:$0xff] }
   0xf   :  { %335 = vmatprep.subr.mxu0 %v425_v0  ;;  %343 = vmatprep.mubr.msk.f32.mxu0 %vm426_vm0, %v425_v0  ;;  %v43_v3 = vld [vmem:[%s517_s1 + $0x8] sm:$0xff]  ;;  %v42_v4 = vld [vmem:[%s517_s1] sm:$0xff]  ;;  %vm53_vm1 = vcmask 261120   ;;  %v131_v6 = vld [vmem:[#allocation2 + $0x18] sm:$0xff]  ;;  %s427_s28 = smov [#allocation5]   ;;  %vm297_vm2 = vcmask 72704  }
  0x10   :  { %346 = vmatprep.subr.mxu1 %v425_v0  ;;  %354 = vmatprep.mubr.msk.f32.mxu1 %vm426_vm0, %v425_v0  ;;  %v41_v5 = vld [vmem:[%s516_s0] sm:$0xff]  ;;  %v130_v7 = vld [vmem:[#allocation2 + $0x10] sm:$0xff]  ;;  %v129_v8 = vld [vmem:[#allocation2 + $0x8] sm:$0xff] }
  0x11   :  { %336 = vmatpush3.msra.mxu0 %v45_v1  ;;  %347 = vmatpush3.msra.mxu1 %v131_v6  ;;  %v128_v9 = vld [vmem:[#allocation2] sm:$0xff]  ;;  %v216_v15 = vld [vmem:[%s521_s5 + $0x18] sm:$0xff]  ;;  %v215_v16 = vld [vmem:[%s521_s5 + $0x10] sm:$0xff] }
  0x12   :  { %337 = vmatprep.subr.mxu0 %v425_v0  ;;  %348 = vmatprep.subr.mxu1 %v425_v0  ;;  %v314_v10 = vld [vmem:[%s518_s2] ss:$0 sm:$0xff]  ;;  %v214_v17 = vld [vmem:[%s521_s5 + $0x8] sm:$0xff] }
  0x13   :  { %338 = vmatpush3.msra.mxu0 %v44_v2  ;;  %349 = vmatpush3.msra.mxu1 %v130_v7  ;;  %v213_v18 = vld [vmem:[%s521_s5] sm:$0xff]  ;;  %s305_s5 = sshll.u32 %s427_s28, 4  ;;  %s306_s5 = int_to_ptr.vmem [resolvable:$true] %s305_s5 }
  0x14   :  { %339 = vmatprep.subr.mxu0 %v425_v0  ;;  %350 = vmatprep.subr.mxu1 %v425_v0  ;;  %v316_v19 = vld [vmem:[%s520_s4] ss:$0 sm:$0xff]  ;;  %s398_s4 = scalar_lea.vmem %s306_s5, 128  ;;  %p403_p6 = scmp.lt.s32.totalorder %s306_s5, %s306_s5 }
  0x15   :  { %340 = vmatpush3.msra.mxu0 %v43_v3  ;;  %351 = vmatpush3.msra.mxu1 %v129_v8  ;;  %v318_v24 = vld [vmem:[%s522_s6] ss:$0 sm:$0xff]  ;;  %p399_p5 = scmp.ne.s32.totalorder %s306_s5, %s398_s4  ;;  %p404_p7 = scmp.lt.s32.totalorder %s398_s4, %s398_s4 }
  0x16   :  { %341 = vmatprep.subr.mxu0 %v425_v0  ;;  %352 = vmatprep.subr.mxu1 %v425_v0 }
  0x17   :  { %342 = vmatpush3.msra.mxu0 %v42_v4  ;;  %353 = vmatpush3.msra.mxu1 %v128_v9  ;;  %p405_p8 = por %p404_p7, %p403_p6 }
  0x18   :  { %344 = vmatmul.mubr.msk.f32.vlgmr.msra.gmra.mxu0 %vm53_vm1, %v41_v5  ;;  %357 = vmatprep.subr.mxu0 %v425_v0 }
  0x19   :  { %365 = vmatprep.mubr.msk.f32.mxu0 %vm426_vm0, %v425_v0  ;;  %358 = vmatpush3.msra.mxu0 %v216_v15  ;;  %p406_p9 = pnand %p405_p8, %p399_p5 }
  0x1a   :  { %359 = vmatprep.subr.mxu0 %v425_v0 }
  0x1b   :  { %360 = vmatpush3.msra.mxu0 %v215_v16 }
  0x1c   :  { %361 = vmatprep.subr.mxu0 %v425_v0 }
  0x1d   :  { %362 = vmatpush3.msra.mxu0 %v214_v17 }
  0x1e   :  { %363 = vmatprep.subr.mxu0 %v425_v0 }
  0x1f   :  { %364 = vmatpush3.msra.mxu0 %v213_v18 }
  0xd8   :  { %v123_v11 = vpop.f32.mrf.mxu0 }
  0xd9   :  { %v124_v12 = vadd.f32 %v314_v10, %v123_v11 }
  0xda   :  { %v345_v13 = vpop.f32.mrf.mxu0 }
  0xdb   :  { %374 = vtanh.f32 %v124_v12 }
  0xe8   :  { %v375_v14 = vpop.eup %374 }
  0xe9   :  { %355 = vmatmul.mubr.msk.f32.vlgmr.msra.gmra.mxu1 %vm53_vm1, %v375_v14 }
 0x1a9   :  { %v208_v20 = vpop.f32.mrf.mxu1 }
 0x1aa   :  { %v209_v21 = vadd.f32 %v316_v19, %v208_v20 }
 0x1ab   :  { %v356_v22 = vpop.f32.mrf.mxu1 }
 0x1ac   :  { %376 = vtanh.f32 %v209_v21 }
 0x1b9   :  { %v377_v23 = vpop.eup %376 }
 0x1ba   :  { %366 = vmatmul.mubr.msk.f32.vlgmr.msra.gmra.mxu0 %vm53_vm1, %v377_v23 }
 0x27a   :  { %v293_v25 = vpop.f32.mrf.mxu0 }
 0x27b   :  { %v294_v26 = vadd.f32 %v318_v24, %v293_v25 }
 0x27c   :  { %v367_v27 = vpop.f32.mrf.mxu0 }
 0x27d   :  { %298 = vst.msk [vmem:[#allocation5] sm:$0xff] %vm297_vm2, %v294_v26 }
 0x27e   :  { %409 = shalt.err (!%p406_p9)
}
 0x27f   :  { %308 = dma.vmem_to_hbm [thread:$0]  %s306_s5, 128, %s523_s7, [#allocation4]  }
 0x280   :  { %420 = dma.done.wait [#allocation4], 128  }
 0x281   :  { %421 = vsyncadd [#allocation4], 4294967168 }
 0x282   :  { %312 = vsyncpa [#allocation3], 1 }
 0x283   :  { %313 = vsyncpa [#allocation4], 1 }

</bundles_post_ra>
